<compile_context>
chip_gen: v7x
topology: tpu7x:2x2x1
jax: 0.10.0
libtpu: 0.0.40
codegen_flags: <defaults>
</compile_context>

<pallas_src>
import functools

import jax
import jax.numpy as jnp
from jax.experimental import pallas as pl
from jax.experimental.pallas import tpu as pltpu


# -----------------------------------------------------------------------------
# Pallas kernel: fused (im2col-matmul conv + bias + ReLU) -> MXU mean pool ->
#                (linear + bias + ReLU) for VT views per grid step.
# -----------------------------------------------------------------------------
def _make_mv_encoder_kernel(hw):
    def kernel(p_ref, w1_ref, b1_ref, w2_ref, b2_ref, out_ref):
        # p_ref   : (1, VT*HW, C*9)  bf16  im2col patches for VT (batch, view) elems
        # w1_ref  : (C*9, HID)       bf16  conv weight reshaped for matmul
        # b1_ref  : (1, HID)         f32
        # w2_ref  : (HID, LP)        bf16  latent projection (lane-padded)
        # b2_ref  : (1, LP)          f32
        # out_ref : (1, VT, LP)      f32
        p = p_ref[0]                                                  # (VT*HW, K)
        h = jnp.dot(p, w1_ref[...], preferred_element_type=jnp.float32)
        h = jnp.maximum(h + b1_ref[...], 0.0)                         # (VT*HW, HID) f32

        vthw = h.shape[0]
        vt = vthw // hw
        # Block-diagonal pooling matrix (VT, VT*HW): mean over each view's HW
        # rows, done on the MXU (which has slack) instead of an XLU sublane
        # reduce.  Cheap per-step construction (few vregs), zero HBM traffic.
        row = jax.lax.broadcasted_iota(jnp.int32, (vt, vthw), 0)
        col = jax.lax.broadcasted_iota(jnp.int32, (vt, vthw), 1)
        in_blk = (col >= row * hw) & (col < (row + 1) * hw)
        pool = jnp.where(in_blk, 1.0 / hw, 0.0).astype(jnp.bfloat16)  # 1/HW exact for HW=256

        pooled = jnp.dot(pool, h.astype(jnp.bfloat16),
                         preferred_element_type=jnp.float32)          # (VT, HID) f32
        z = jnp.dot(pooled.astype(jnp.bfloat16), w2_ref[...],
                    preferred_element_type=jnp.float32)               # (VT, LP) f32
        out_ref[0] = jnp.maximum(z + b2_ref[...], 0.0)                # lane-dense store
    return kernel


def _im2col_3x3_same(x):
    """x: (N, C, H, W) -> (N, H*W, C*9) patches (order must match w1 reshape)."""
    n, c, h, w = x.shape
    patches = jax.lax.conv_general_dilated_patches(
        x, filter_shape=(3, 3), window_strides=(1, 1), padding="SAME"
    )  # (N, C*9, H, W)
    return patches.transpose(0, 2, 3, 1).reshape(n, h * w, c * 9)


def _pick_view_tile(r, hw, k, budget_bytes=4 << 20):
    """Largest divisor vt of r whose bf16 patch block fits the VMEM budget."""
    best = 1
    for vt in range(1, r + 1):
        if r % vt == 0 and vt * hw * k * 2 <= budget_bytes:
            best = vt
    return best


def multi_view_encode(obs, params):
    """obs: (bs, V, C, H, W) -> (bs, V, latent_dim)."""
    bs, v, c, h, w = obs.shape
    w1, b1, w2, b2 = params
    hw = h * w
    k = c * 9
    hid = w1.shape[1]
    latent = w2.shape[1]
    latent_pad = ((latent + 127) // 128) * 128
    bsv = bs * v

    # bf16 before im2col so the HBM-materialized patch slab is half the bytes.
    patches = _im2col_3x3_same(
        obs.reshape(bsv, c, h, w).astype(jnp.bfloat16)
    )  # (bs*V, HW, C*9) bf16

    # 2-wide parallel axis so both v7x TensorCores get work; single step elsewhere.
    g = 2 if bsv % 2 == 0 else 1
    r = bsv // g
    # View tiling keeps the per-step patch block VMEM-bounded for large shapes
    # (nt == 1 at small shapes, i.e. identical schedule to the validated run).
    vt = _pick_view_tile(r, hw, k)
    nt = r // vt
    patches = patches.reshape(g, r * hw, k)

    w1b = w1.astype(jnp.bfloat16)
    w2p = jnp.pad(w2, ((0, 0), (0, latent_pad - latent))).astype(jnp.bfloat16)
    b2p = jnp.pad(b2, ((0, 0), (0, latent_pad - latent))).astype(jnp.float32)
    b1f = b1.astype(jnp.float32)

    flops = (2 * bsv * hw * k * hid          # conv-as-matmul
             + 2 * bsv * hw * hid            # MXU mean pool
             + 2 * bsv * hid * latent_pad)   # latent projection
    bytes_accessed = (patches.size * 2 + w1b.size * 2 + b1f.size * 4
                      + w2p.size * 2 + b2p.size * 4 + bsv * latent_pad * 4)

    out = pl.pallas_call(
        _make_mv_encoder_kernel(hw),
        out_shape=jax.ShapeDtypeStruct((g, r, latent_pad), jnp.float32),
        grid=(g, nt),
        in_specs=[
            pl.BlockSpec((1, vt * hw, k), lambda i, j: (i, j, 0)),
            pl.BlockSpec((k, hid), lambda i, j: (0, 0)),
            pl.BlockSpec((1, hid), lambda i, j: (0, 0)),
            pl.BlockSpec((hid, latent_pad), lambda i, j: (0, 0)),
            pl.BlockSpec((1, latent_pad), lambda i, j: (0, 0)),
        ],
        out_specs=pl.BlockSpec((1, vt, latent_pad), lambda i, j: (i, j, 0)),
        compiler_params=pltpu.CompilerParams(
            dimension_semantics=("parallel", "parallel")),
        cost_estimate=pl.CostEstimate(
            flops=flops, transcendentals=0, bytes_accessed=bytes_accessed),
    )(patches, w1b, b1f, w2p, b2p)

    out = out.reshape(bsv, latent_pad)[:, :latent]
    return out.reshape(bs, v, latent)


def init_params(key, in_channels, hidden, latent_dim):
    """Deterministic synthetic parameters for the multi-view encoder."""
    k1, k2, k3, k4 = jax.random.split(key, 4)
    k = in_channels * 9
    w1 = jax.random.normal(k1, (k, hidden), jnp.float32) * (1.0 / jnp.sqrt(k))
    b1 = jax.random.normal(k2, (1, hidden), jnp.float32) * 0.01
    w2 = jax.random.normal(k3, (hidden, latent_dim), jnp.float32) * (
        1.0 / jnp.sqrt(hidden)
    )
    b2 = jax.random.normal(k4, (1, latent_dim), jnp.float32) * 0.01
    return w1, b1, w2, b2


def zero_task_model_forward(curr_obs, final_obs, dof, params):
    """Mirror of ZeroTaskModel.forward.

    Returns (0, task_embed, task_embed, final_x.view(bs, -1)).
    """
    bs = curr_obs.shape[0]
    final_x = multi_view_encode(final_obs, params)      # (bs, V, latent)
    task_embed = jnp.zeros_like(dof)
    return 0, task_embed, task_embed, final_x.reshape(bs, -1)


if __name__ == "__main__":
    # Small shapes consistent with the module's forward:
    #   curr_obs / final_obs : (bs, V, C, H, W)   multi-view RGB-D-ish stacks
    #   dof                  : (bs, dof_dim)
    bs, V, C, H, W = 2, 3, 4, 16, 16
    hidden, latent_dim = 32, 64
    dof_dim = 8

    key = jax.random.PRNGKey(0)
    k_curr, k_final, k_dof, k_params = jax.random.split(key, 4)

    curr_obs = jax.random.normal(k_curr, (bs, V, C, H, W), jnp.float32)
    final_obs = jax.random.normal(k_final, (bs, V, C, H, W), jnp.float32)
    dof = jax.random.normal(k_dof, (bs, dof_dim), jnp.float32)

    params = init_params(k_params, C, hidden, latent_dim)

    fwd = jax.jit(functools.partial(zero_task_model_forward, params=params))
    zero, task_embed, task_embed2, final_x_flat = fwd(curr_obs, final_obs, dof)

    jax.block_until_ready(final_x_flat)
    jax.block_until_ready(task_embed)

    assert zero == 0
    assert task_embed.shape == dof.shape and task_embed.dtype == dof.dtype
    assert bool(jnp.all(task_embed == 0))
    assert final_x_flat.shape == (bs, V * latent_dim)
    assert bool(jnp.all(jnp.isfinite(final_x_flat)))

    print("KERNEL_OK")
</pallas_src>

<mosaic_0001>
module attributes {stable_mosaic.version = 11 : i64} {
  func.func @kernel(%arg0: i32, %arg1: i32, %arg2: memref<1x768x36xbf16, #tpu.memory_space<vmem>>, %arg3: memref<36x32xbf16, #tpu.memory_space<vmem>>, %arg4: memref<1x32xf32, #tpu.memory_space<vmem>>, %arg5: memref<32x128xbf16, #tpu.memory_space<vmem>>, %arg6: memref<1x128xf32, #tpu.memory_space<vmem>>, %arg7: memref<1x3x128xf32, #tpu.memory_space<vmem>>) attributes {dimension_semantics = [#tpu.dimension_semantics<parallel>, #tpu.dimension_semantics<parallel>], iteration_bounds = array<i64: 2, 1>, scalar_prefetch = 0 : i64, scratch_operands = 0 : i64, tpu.core_type = #tpu.core_type<tc>, window_params = [{transform_indices = @transform_0, window_bounds = array<i64: 1, 768, 36>}, {pipeline_mode = #tpu.pipeline_mode<synchronous>, transform_indices = @transform_1, window_bounds = array<i64: 36, 32>}, {pipeline_mode = #tpu.pipeline_mode<synchronous>, transform_indices = @transform_2, window_bounds = array<i64: 1, 32>}, {pipeline_mode = #tpu.pipeline_mode<synchronous>, transform_indices = @transform_3, window_bounds = array<i64: 32, 128>}, {pipeline_mode = #tpu.pipeline_mode<synchronous>, transform_indices = @transform_4, window_bounds = array<i64: 1, 128>}, {transform_indices = @transform_5, window_bounds = array<i64: 1, 3, 128>}]} {
    %c0 = arith.constant 0 : index
    %c0_0 = arith.constant 0 : index
    %c0_1 = arith.constant 0 : index
    %0 = vector.load %arg2[%c0, %c0_0, %c0_1] : memref<1x768x36xbf16, #tpu.memory_space<vmem>>, vector<1x768x36xbf16>
    %1 = vector.shape_cast %0 : vector<1x768x36xbf16> to vector<768x36xbf16>
    %c0_2 = arith.constant 0 : index
    %c0_3 = arith.constant 0 : index
    %2 = vector.load %arg3[%c0_2, %c0_3] : memref<36x32xbf16, #tpu.memory_space<vmem>>, vector<36x32xbf16>
    %cst = arith.constant dense<0.000000e+00> : vector<768x32xf32>
    %3 = tpu.matmul %1, %2, %cst {dimension_numbers = #tpu.dot_dimension_numbers<[1], [0], [0], [1], [0, 0, 1, 1], [], []>} : vector<768x36xbf16>, vector<36x32xbf16>, vector<768x32xf32> -> vector<768x32xf32>
    %c0_4 = arith.constant 0 : index
    %c0_5 = arith.constant 0 : index
    %4 = vector.load %arg4[%c0_4, %c0_5] : memref<1x32xf32, #tpu.memory_space<vmem>>, vector<1x32xf32>
    %5 = vector.broadcast %4 : vector<1x32xf32> to vector<768x32xf32>
    %6 = arith.addf %3, %5 : vector<768x32xf32>
    %cst_6 = arith.constant 0.000000e+00 : f32
    %7 = vector.broadcast %cst_6 : f32 to vector<768x32xf32>
    %8 = arith.maximumf %6, %7 : vector<768x32xf32>
    %9 = tpu.iota {dimensions = array<i32: 0>} : vector<3x768xi32>
    %10 = tpu.iota {dimensions = array<i32: 1>} : vector<3x768xi32>
    %c256_i32 = arith.constant 256 : i32
    %11 = vector.broadcast %c256_i32 : i32 to vector<3x768xi32>
    %12 = arith.muli %9, %11 : vector<3x768xi32>
    %13 = arith.cmpi sge, %10, %12 : vector<3x768xi32>
    %c1_i32 = arith.constant 1 : i32
    %14 = vector.broadcast %c1_i32 : i32 to vector<3x768xi32>
    %15 = arith.addi %9, %14 : vector<3x768xi32>
    %c256_i32_7 = arith.constant 256 : i32
    %16 = vector.broadcast %c256_i32_7 : i32 to vector<3x768xi32>
    %17 = arith.muli %15, %16 : vector<3x768xi32>
    %18 = arith.cmpi slt, %10, %17 : vector<3x768xi32>
    %19 = arith.andi %13, %18 : vector<3x768xi1>
    %cst_8 = arith.constant 3.906250e-03 : f32
    %cst_9 = arith.constant 0.000000e+00 : f32
    %20 = vector.broadcast %cst_8 : f32 to vector<3x768xf32>
    %21 = vector.broadcast %cst_9 : f32 to vector<3x768xf32>
    %22 = arith.select %19, %20, %21 : vector<3x768xi1>, vector<3x768xf32>
    %23 = arith.truncf %22 : vector<3x768xf32> to vector<3x768xbf16>
    %24 = arith.truncf %8 : vector<768x32xf32> to vector<768x32xbf16>
    %cst_10 = arith.constant dense<0.000000e+00> : vector<3x32xf32>
    %25 = tpu.matmul %23, %24, %cst_10 {dimension_numbers = #tpu.dot_dimension_numbers<[1], [0], [0], [1], [0, 0, 1, 1], [], []>} : vector<3x768xbf16>, vector<768x32xbf16>, vector<3x32xf32> -> vector<3x32xf32>
    %26 = arith.truncf %25 : vector<3x32xf32> to vector<3x32xbf16>
    %c0_11 = arith.constant 0 : index
    %c0_12 = arith.constant 0 : index
    %27 = vector.load %arg5[%c0_11, %c0_12] : memref<32x128xbf16, #tpu.memory_space<vmem>>, vector<32x128xbf16>
    %cst_13 = arith.constant dense<0.000000e+00> : vector<3x128xf32>
    %28 = tpu.matmul %26, %27, %cst_13 {dimension_numbers = #tpu.dot_dimension_numbers<[1], [0], [0], [1], [0, 0, 1, 1], [], []>} : vector<3x32xbf16>, vector<32x128xbf16>, vector<3x128xf32> -> vector<3x128xf32>
    %c0_14 = arith.constant 0 : index
    %c0_15 = arith.constant 0 : index
    %29 = vector.load %arg6[%c0_14, %c0_15] : memref<1x128xf32, #tpu.memory_space<vmem>>, vector<1x128xf32>
    %30 = vector.broadcast %29 : vector<1x128xf32> to vector<3x128xf32>
    %31 = arith.addf %28, %30 : vector<3x128xf32>
    %cst_16 = arith.constant 0.000000e+00 : f32
    %32 = vector.broadcast %cst_16 : f32 to vector<3x128xf32>
    %33 = arith.maximumf %31, %32 : vector<3x128xf32>
    %c0_17 = arith.constant 0 : index
    %c0_18 = arith.constant 0 : index
    %c0_19 = arith.constant 0 : index
    %34 = vector.load %arg7[%c0_17, %c0_18, %c0_19] : memref<1x3x128xf32, #tpu.memory_space<vmem>>, vector<1x3x128xf32>
    %35 = vector.shape_cast %34 : vector<1x3x128xf32> to vector<3x128xf32>
    %36 = vector.shape_cast %33 : vector<3x128xf32> to vector<1x3x128xf32>
    tpu.vector_store %arg7[%c0_17, %c0_18, %c0_19], %36 {strides = array<i32>} : memref<1x3x128xf32, #tpu.memory_space<vmem>>, vector<1x3x128xf32>,
    return
  }
  func.func @transform_0(%arg0: i32, %arg1: i32) -> (i32, i32, i32) {
    %c0_i32 = arith.constant 0 : i32
    %c0_i32_0 = arith.constant 0 : i32
    return %arg0, %arg1, %c0_i32 : i32, i32, i32
  }
  func.func @transform_1(%arg0: i32, %arg1: i32) -> (i32, i32) {
    %c0_i32 = arith.constant 0 : i32
    %c0_i32_0 = arith.constant 0 : i32
    %c0_i32_1 = arith.constant 0 : i32
    return %c0_i32, %c0_i32_0 : i32, i32
  }
  func.func @transform_2(%arg0: i32, %arg1: i32) -> (i32, i32) {
    %c0_i32 = arith.constant 0 : i32
    %c0_i32_0 = arith.constant 0 : i32
    %c0_i32_1 = arith.constant 0 : i32
    return %c0_i32, %c0_i32_0 : i32, i32
  }
  func.func @transform_3(%arg0: i32, %arg1: i32) -> (i32, i32) {
    %c0_i32 = arith.constant 0 : i32
    %c0_i32_0 = arith.constant 0 : i32
    %c0_i32_1 = arith.constant 0 : i32
    return %c0_i32, %c0_i32_0 : i32, i32
  }
  func.func @transform_4(%arg0: i32, %arg1: i32) -> (i32, i32) {
    %c0_i32 = arith.constant 0 : i32
    %c0_i32_0 = arith.constant 0 : i32
    %c0_i32_1 = arith.constant 0 : i32
    return %c0_i32, %c0_i32_0 : i32, i32
  }
  func.func @transform_5(%arg0: i32, %arg1: i32) -> (i32, i32, i32) {
    %c0_i32 = arith.constant 0 : i32
    %c0_i32_0 = arith.constant 0 : i32
    return %arg0, %arg1, %c0_i32 : i32, i32, i32
  }
}

</mosaic_0001>

<bundles_post_ra>
// kernel: zero_task_model_forward.1
= control target key start
LH: loop header
LB: loop body
LE: loop exit
PB: predicated region body
PF: predicated region fallthrough
CT: control target
= control target key end

     0   :  { %s2143_s18 = smov 0   ;;  %s2145_s19 = smov 0   ;;  %s2542_s0 = inlined_call_operand.vmem [shape: bf16[2,768,36], index: 0, kind: input, shape index: {}]   ;;  %s2543_s1 = inlined_call_operand.vmem [shape: bf16[36,32], index: 1, kind: input, shape index: {}]   ;;  %s2544_s2 = inlined_call_operand.vmem [shape: f32[1,32], index: 2, kind: input, shape index: {}]   ;;  %s2545_s3 = inlined_call_operand.vmem [shape: bf16[32,128], index: 3, kind: input, shape index: {}]   ;;  %s2546_s4 = inlined_call_operand.vmem [shape: f32[1,128], index: 4, kind: input, shape index: {}]   ;;  %s2547_s5 = inlined_call_operand.vmem [shape: f32[2,3,128], index: 5, kind: output, shape index: {}]  }
   0x1   :  { %s2147_s20 = smov 0  }
   0x2 LB: > { %s27_s21 = sadd.s32 1, %s2104_s19  ;;  %p1646_p0 = scmp.ge.s32.totalorder %s2108_s20, 1  ;;  %s2108_s20 = sphi %s2147_s20, %s15_s20   ;;  %s2104_s19 = sphi %s2145_s19, %s2553_s19   ;;  %s2100_s18 = sphi %s2143_s18, %s2552_s18  }
   0x3   : > { %p29_p1 = scmp.ge.s32.totalorder %s27_s21, 2  ;;  %p208_p2 = scmp.lt.s32.totalorder %s2108_s20, 3 }
   0x5   : > { %s2555_s21 = smov (%p29_p1, %s27_s21), 0  ;;  %p209_p3 = pnand %p1646_p0, %p208_p2 }
   0x6   : > { %v2033_v0 = vld [vmem:[%s2543_s1] sm:$0xff] (!%p209_p3)   ;;  %v2034_v1 = vld [vmem:[%s2543_s1 + $0x8] sm:$0xff] (!%p209_p3)   ;;  %p243_p4 = scmp.lt.s32.totalorder (!%p209_p3), %s2100_s18, 1  ;;  %v2035_v2 = vld [vmem:[%s2543_s1 + $0x10] ss:$0 sps:$4 sm:$0x33] (!%p209_p3)   ;;  %v1285_v52 = vlaneseq (!%p209_p3) }
   0x7   : > { %212 = sbr.rel (%p209_p3) target bundleno = 837 (0x345), region = 40  ;;  %1887 = vmatprep.subr.bf16.mxu0 (!%p209_p3), %v2033_v0  ;;  %1997 = vmatprep.subr.bf16.mxu1 (!%p209_p3), %v2033_v0  ;;  %vm768_vm0 = vcmask (!%p209_p3), 1041408   ;;  %vm623_vm1 = vcmask (!%p209_p3), 293888   ;;  %v2110_v59 = vmov (!%p209_p3), 0.00390625|0.00390625  }
   0x8   : > { %1888 = vmatpush3.bf16.msra.mxu0 (!%p209_p3), %v2033_v0  ;;  %2000 = vmatpush3.bf16.msra.mxu1 (!%p209_p3), %v2033_v0  ;;  %v770_v3 = vsel (!%p209_p3), %vm768_vm0, %v2035_v2, 0  ;;  %v1286_v53 = vshrl.u32 (!%p209_p3), %v1285_v52, 7  ;;  %v2274_v54 = vand.u32 (!%p209_p3), 127, %v1285_v52  ;;  %v2287_v60 = vld [vmem:[%s2544_s2] ss:$0 sm:$0xff] (!%p209_p3) }
   0x9   : > { %1889 = vmatprep.subr.bf16.mxu0 (!%p209_p3), %v2034_v1  ;;  %1998 = vmatprep.subr.bf16.mxu1 (!%p209_p3), %v2034_v1 }
   0xa   : > { %v1301_v55 = vadd.s32 (!%p209_p3), 1, %v1286_v53  ;;  %v1289_v56 = vadd.s32 (!%p209_p3), 128, %v2274_v54  ;;  %v2277_v57 = vmul.u32 (!%p209_p3), 256, %v1286_v53 }
   0xc   : > { %1890 = vmatpush3.bf16.msra.mxu0 (!%p209_p3), %v2034_v1  ;;  %2001 = vmatpush3.bf16.msra.mxu1 (!%p209_p3), %v2034_v1  ;;  %v2279_v58 = vmul.u32 (!%p209_p3), 256, %v1301_v55  ;;  %vm1296_vm2 = vcmp.ge.s32.totalorder (!%p209_p3), %v1289_v56, %v2277_v57  ;;  %vm1295_vm6 = vcmp.ge.s32.totalorder (!%p209_p3), %v2274_v54, %v2277_v57 }
   0xd   : > { %2003 = vmatprep.subr.msk.bf16.mxu0 (!%p209_p3), %vm768_vm0, %v2035_v2  ;;  %2004 = vmatprep.subr.msk.bf16.mxu1 (!%p209_p3), %vm768_vm0, %v2035_v2 }
   0xe   : > { %s2557_s18 = smov (!%p243_p4, %s2100_s18), 1  ;;  %vm1304_vm3 = vcmp.lt.s32.totalorder %v1289_v56, %v2279_v58  ;;  %vm1303_vm7 = vcmp.lt.s32.totalorder %v2274_v54, %v2279_v58 }
   0xf   : > { %s2005_s28 = smul.u32 384, %s2557_s18  ;;  %vm1310_vm4 = vmand %vm1296_vm2, %vm1304_vm3  ;;  %s1648_s15 = sshll.u32 %s2557_s18, 2 }
  0x10   : > { %1892 = vmatpush3.bf16.msra.mxu0 %v770_v3  ;;  %2002 = vmatpush3.bf16.msra.mxu1 %v770_v3  ;;  %vm1749_vm5 = vmpackc.low %vm1310_vm4, %vm1310_vm4  ;;  %s258_s22 = scalar_lea.vmem %s2547_s5, %s1648_s15 }
  0x11   : > { %s2176_s6 = scalar_lea.vmem %s2542_s0, %s2005_s28  ;;  %vm2405_vm10 = vmand %vm1295_vm6, %vm1303_vm7 }
  0x12   : > { %v2036_v4 = vld [vmem:[%s2176_s6] sm:$0xff]   ;;  %v2037_v5 = vld [vmem:[%s2176_s6 + $0x8] sm:$0xff]   ;;  %v2038_v6 = vld [vmem:[%s2176_s6 + $0x10] sm:$0xff]  }
  0x13   : > { %1893 = vmatprep.mubr.msk.bf16.mxu0 %vm623_vm1, %v2036_v4  ;;  %v2039_v7 = vld [vmem:[%s2176_s6 + $0x18] sm:$0xff]   ;;  %v2040_v8 = vld [vmem:[%s2176_s6 + $0x20] sm:$0xff]   ;;  %v2041_v9 = vld [vmem:[%s2176_s6 + $0x28] sm:$0xff]  }
  0x14   : > { %1894 = vmatmul.mubr.msk.bf16.vlgmr.msra.gmra.mrb[0].mxu0 %vm623_vm1, %v2037_v5  ;;  %v2042_v10 = vld [vmem:[%s2176_s6 + $0x30] sm:$0xff]   ;;  %v2043_v11 = vld [vmem:[%s2176_s6 + $0x38] sm:$0xff]   ;;  %v2044_v12 = vld [vmem:[%s2176_s6 + $0x40] sm:$0xff]  }
  0x15   : > { %1897 = vmatprep.mubr.msk.bf16.mxu0 %vm623_vm1, %v2038_v6  ;;  %v2062_v13 = vld [vmem:[%s2176_s6 + $0x110] sm:$0xff]   ;;  %v2063_v14 = vld [vmem:[%s2176_s6 + $0x118] sm:$0xff]   ;;  %v2066_v15 = vld [vmem:[%s2176_s6 + $0x120] sm:$0xff]  }
  0x16   : > { %1961 = vmatprep.mubr.msk.bf16.mxu1 %vm623_vm1, %v2062_v13  ;;  %v2045_v16 = vld [vmem:[%s2176_s6 + $0x48] sm:$0xff]   ;;  %v2070_v18 = vld [vmem:[%s2176_s6 + $0x130] sm:$0xff]   ;;  %v2047_v20 = vld [vmem:[%s2176_s6 + $0x58] sm:$0xff]  }
  0x17   : > { %1962 = vmatmul.mubr.msk.bf16.vlgmr.msra.gmra.mrb[0].mxu1 %vm623_vm1, %v2063_v14  ;;  %v2067_v17 = vld [vmem:[%s2176_s6 + $0x128] sm:$0xff]   ;;  %v2046_v19 = vld [vmem:[%s2176_s6 + $0x50] sm:$0xff]   ;;  %v2071_v21 = vld [vmem:[%s2176_s6 + $0x138] sm:$0xff]  }
  0x18   : > { %1965 = vmatprep.mubr.msk.bf16.mxu1 %vm623_vm1, %v2066_v15  ;;  %v2074_v22 = vld [vmem:[%s2176_s6 + $0x140] sm:$0xff]   ;;  %v2075_v24 = vld [vmem:[%s2176_s6 + $0x148] sm:$0xff]   ;;  %v2078_v26 = vld [vmem:[%s2176_s6 + $0x150] sm:$0xff]  }
  0x19   : > { %v2048_v23 = vld [vmem:[%s2176_s6 + $0x60] sm:$0xff]   ;;  %v2049_v25 = vld [vmem:[%s2176_s6 + $0x68] sm:$0xff]   ;;  %v2050_v27 = vld [vmem:[%s2176_s6 + $0x70] sm:$0xff]  }
  0x1a   : > { %v2079_v28 = vld [vmem:[%s2176_s6 + $0x158] sm:$0xff]   ;;  %v2080_v30 = vld [vmem:[%s2176_s6 + $0x160] sm:$0xff]   ;;  %v2081_v32 = vld [vmem:[%s2176_s6 + $0x168] sm:$0xff]  }
  0x1b   : > { %v2051_v29 = vld [vmem:[%s2176_s6 + $0x78] sm:$0xff]   ;;  %v2052_v31 = vld [vmem:[%s2176_s6 + $0x80] sm:$0xff]   ;;  %v2053_v33 = vld [vmem:[%s2176_s6 + $0x88] sm:$0xff]  }
  0x1c   : > { %1898 = vmatmul.mubr.msk.bf16.gmra.mrb[4].mxu0 %vm623_vm1, %v2039_v7  ;;  %v2082_v34 = vld [vmem:[%s2176_s6 + $0x170] sm:$0xff]   ;;  %v2083_v36 = vld [vmem:[%s2176_s6 + $0x178] sm:$0xff]   ;;  %v2056_v38 = vld [vmem:[%s2176_s6 + $0xa0] sm:$0xff]  }
  0x1d   : > { %1901 = vmatprep.mubr.msk.bf16.mxu0 %vm623_vm1, %v2040_v8  ;;  %v2054_v35 = vld [vmem:[%s2176_s6 + $0x90] sm:$0xff]   ;;  %v2055_v37 = vld [vmem:[%s2176_s6 + $0x98] sm:$0xff]   ;;  %v2057_v39 = vld [vmem:[%s2176_s6 + $0xa8] sm:$0xff]  }
  0x1e   : > { %v2058_v40 = vld [vmem:[%s2176_s6 + $0xb0] sm:$0xff]   ;;  %v2059_v41 = vld [vmem:[%s2176_s6 + $0xb8] sm:$0xff]   ;;  %v2060_v42 = vld [vmem:[%s2176_s6 + $0xc0] sm:$0xff]  }
  0x1f   : > { %1966 = vmatmul.mubr.msk.bf16.gmra.mrb[4].mxu1 %vm623_vm1, %v2067_v17  ;;  %v2061_v43 = vld [vmem:[%s2176_s6 + $0xc8] sm:$0xff]   ;;  %v2064_v44 = vld [vmem:[%s2176_s6 + $0xd0] sm:$0xff]   ;;  %v2065_v45 = vld [vmem:[%s2176_s6 + $0xd8] sm:$0xff]  }
  0x20   : > { %1969 = vmatprep.mubr.msk.bf16.mxu1 %vm623_vm1, %v2070_v18  ;;  %v2068_v46 = vld [vmem:[%s2176_s6 + $0xe0] sm:$0xff]   ;;  %v2069_v47 = vld [vmem:[%s2176_s6 + $0xe8] sm:$0xff]   ;;  %v2072_v48 = vld [vmem:[%s2176_s6 + $0xf0] sm:$0xff]  }
  0x21   : > { %v2073_v49 = vld [vmem:[%s2176_s6 + $0xf8] sm:$0xff]   ;;  %v2076_v50 = vld [vmem:[%s2176_s6 + $0x100] sm:$0xff]   ;;  %v2077_v51 = vld [vmem:[%s2176_s6 + $0x108] sm:$0xff]  }
  0x22   : > { %vm1751_vm12 = vmpackc.low %vm2405_vm10, %vm2405_vm10  ;;  %vm2112_vm10 = vmmov 0  }
  0x24   : > { %1902 = vmatmul.mubr.msk.bf16.gmra.mrb[8].mxu0 %vm623_vm1, %v2041_v9 }
  0x25   : > { %1905 = vmatprep.mubr.msk.bf16.mxu0 %vm623_vm1, %v2042_v10 }
  0x27   : > { %1970 = vmatmul.mubr.msk.bf16.gmra.mrb[8].mxu1 %vm623_vm1, %v2071_v21 }
  0x28   : > { %1973 = vmatprep.mubr.msk.bf16.mxu1 %vm623_vm1, %v2074_v22 }
  0x2c   : > { %1906 = vmatmul.mubr.msk.bf16.gmra.mrb[12].mxu0 %vm623_vm1, %v2043_v11 }
  0x2d   : > { %1909 = vmatprep.mubr.msk.bf16.mxu0 %vm623_vm1, %v2044_v12 }
  0x2f   : > { %1974 = vmatmul.mubr.msk.bf16.gmra.mrb[12].mxu1 %vm623_vm1, %v2075_v24 }
  0x30   : > { %1977 = vmatprep.mubr.msk.bf16.mxu1 %vm623_vm1, %v2078_v26 }
  0x34   : > { %1910 = vmatmul.mubr.msk.bf16.gmra.mrb[16].mxu0 %vm623_vm1, %v2045_v16 }
  0x35   : > { %1913 = vmatprep.mubr.msk.bf16.mxu0 %vm623_vm1, %v2046_v19 }
  0x37   : > { %1978 = vmatmul.mubr.msk.bf16.gmra.mrb[16].mxu1 %vm623_vm1, %v2079_v28 }
  0x38   : > { %1981 = vmatprep.mubr.msk.bf16.mxu1 %vm623_vm1, %v2080_v30 }
  0x3c   : > { %1914 = vmatmul.mubr.msk.bf16.gmra.mrb[20].mxu0 %vm623_vm1, %v2047_v20 }
  0x3d   : > { %1917 = vmatprep.mubr.msk.bf16.mxu0 %vm623_vm1, %v2048_v23 }
  0x3f   : > { %1982 = vmatmul.mubr.msk.bf16.gmra.mrb[20].mxu1 %vm623_vm1, %v2081_v32 }
  0x40   : > { %1985 = vmatprep.mubr.msk.bf16.mxu1 %vm623_vm1, %v2082_v34 }
  0x44   : > { %1918 = vmatmul.mubr.msk.bf16.gmra.mrb[24].mxu0 %vm623_vm1, %v2049_v25 }
  0x45   : > { %1921 = vmatprep.mubr.msk.bf16.mxu0 %vm623_vm1, %v2050_v27 }
  0x47   : > { %1986 = vmatmul.mubr.msk.bf16.gmra.mrb[24].mxu1 %vm623_vm1, %v2083_v36 }
  0x48   : > { %1750 = vmatprep.mubr.msk.bf16.mxu1 %vm1749_vm5, %v2110_v59 }
  0x4c   : > { %1922 = vmatmul.mubr.msk.bf16.gmra.mrb[28].mxu0 %vm623_vm1, %v2051_v29 }
  0x4d   : > { %1925 = vmatprep.mubr.msk.bf16.mxu0 %vm623_vm1, %v2052_v31 }
  0x54   : > { %1926 = vmatmul.mubr.msk.bf16.gmra.mrb[32].mxu0 %vm623_vm1, %v2053_v33 }
  0x55   : > { %1929 = vmatprep.mubr.msk.bf16.mxu0 %vm623_vm1, %v2054_v35 }
  0x5c   : > { %1930 = vmatmul.mubr.msk.bf16.gmra.mrb[36].mxu0 %vm623_vm1, %v2055_v37 }
  0x5d   : > { %1933 = vmatprep.mubr.msk.bf16.mxu0 %vm623_vm1, %v2056_v38 }
  0x64   : > { %1934 = vmatmul.mubr.msk.bf16.gmra.mrb[40].mxu0 %vm623_vm1, %v2057_v39 }
  0x65   : > { %1937 = vmatprep.mubr.msk.bf16.mxu0 %vm623_vm1, %v2058_v40 }
  0x6c   : > { %1938 = vmatmul.mubr.msk.bf16.gmra.mrb[44].mxu0 %vm623_vm1, %v2059_v41 }
  0x6d   : > { %1941 = vmatprep.mubr.msk.bf16.mxu0 %vm623_vm1, %v2060_v42 }
  0x74   : > { %1942 = vmatmul.mubr.msk.bf16.gmra.mrb[48].mxu0 %vm623_vm1, %v2061_v43 }
  0x75   : > { %1945 = vmatprep.mubr.msk.bf16.mxu0 %vm623_vm1, %v2064_v44 }
  0x7c   : > { %1946 = vmatmul.mubr.msk.bf16.gmra.mrb[52].mxu0 %vm623_vm1, %v2065_v45 }
  0x7d   : > { %1949 = vmatprep.mubr.msk.bf16.mxu0 %vm623_vm1, %v2068_v46 }
  0x84   : > { %1950 = vmatmul.mubr.msk.bf16.gmra.mrb[56].mxu0 %vm623_vm1, %v2069_v47 }
  0x85   : > { %1953 = vmatprep.mubr.msk.bf16.mxu0 %vm623_vm1, %v2072_v48 }
  0x8c   : > { %1954 = vmatmul.mubr.msk.bf16.gmra.mrb[60].mxu0 %vm623_vm1, %v2073_v49 }
  0x8d   : > { %1957 = vmatprep.mubr.msk.bf16.mxu0 %vm623_vm1, %v2076_v50 }
  0x94   : > { %1958 = vmatmul.mubr.msk.bf16.gmra.mrb[64].mxu0 %vm623_vm1, %v2077_v51 }
  0xe7   : > { %v1895_v61 = vpop.f32.mrb[0].mxu0 }
  0xe8   : > { %v815_v62 = vadd.f32 %v1895_v61, %v2287_v60  ;;  %v806_v63 = vpop.f32.mrb[1].mxu0 }
  0xe9   : > { %v807_v0 = vadd.f32 %v2287_v60, %v806_v63  ;;  %v1896_v1 = vpop.f32.mrb[2].mxu0 }
  0xea   : > { %v818_v2 = vadd.f32 %v1896_v1, %v2287_v60  ;;  %v809_v3 = vpop.f32.mrb[3].mxu0  ;;  %v1191_v5 = vmax.f32 %v815_v62, 0.0  ;;  %v1963_v38 = vpop.f32.mrb[0].mxu1 }
  0xeb   : > { %v810_v4 = vadd.f32 %v2287_v60, %v809_v3  ;;  %v1189_v7 = vmax.f32 %v807_v0, 0.0  ;;  %v1087_v41 = vadd.f32 %v1963_v38, %v2287_v60  ;;  %v1078_v42 = vpop.f32.mrb[1].mxu1 }
  0xec   : > { %v1192_v6 = vmax.f32 %v818_v2, 0.0  ;;  %v1079_v45 = vadd.f32 %v2287_v60, %v1078_v42  ;;  %v1964_v46 = vpop.f32.mrb[2].mxu1 }
  0xed   : > { %v1190_v8 = vmax.f32 %v810_v4, 0.0  ;;  %v1259_v49 = vmax.f32 %v1087_v41, 0.0  ;;  %v1090_v50 = vadd.f32 %v1964_v46, %v2287_v60  ;;  %v1081_v51 = vpop.f32.mrb[3].mxu1 }
  0xee   : > { %v2293_v9 = vpack.c.bf16 %v1192_v6, %v1191_v5  ;;  %v1257_v55 = vmax.f32 %v1079_v45, 0.0  ;;  %v1082_v56 = vadd.f32 %v2287_v60, %v1081_v51 }
  0xef   : > { %v2295_v10 = vpack.c.bf16 %v1190_v8, %v1189_v7  ;;  %v1899_v11 = vpop.f32.mrb[4].mxu0  ;;  %v1260_v62 = vmax.f32 %v1090_v50, 0.0 }
  0xf0   : > { %v831_v12 = vadd.f32 %v1899_v11, %v2287_v60  ;;  %v822_v13 = vpop.f32.mrb[5].mxu0  ;;  %v1258_v1 = vmax.f32 %v1082_v56, 0.0 }
  0xf1   : > { %v823_v14 = vadd.f32 %v2287_v60, %v822_v13  ;;  %v1900_v15 = vpop.f32.mrb[6].mxu0  ;;  %v2321_v4 = vpack.c.bf16 %v1260_v62, %v1259_v49 }
  0xf2   : > { %v834_v16 = vadd.f32 %v1900_v15, %v2287_v60  ;;  %v825_v17 = vpop.f32.mrb[7].mxu0  ;;  %v1195_v19 = vmax.f32 %v831_v12, 0.0  ;;  %v2325_v6 = vpack.c.bf16 %v1258_v1, %v1257_v55  ;;  %v1967_v7 = vpop.f32.mrb[4].mxu1 }
  0xf3   : > { %v826_v18 = vadd.f32 %v2287_v60, %v825_v17  ;;  %v1193_v21 = vmax.f32 %v823_v14, 0.0  ;;  %v1103_v12 = vadd.f32 %v1967_v7, %v2287_v60  ;;  %v1094_v13 = vpop.f32.mrb[5].mxu1 }
  0xf4   : > { %v1196_v20 = vmax.f32 %v834_v16, 0.0  ;;  %v1095_v16 = vadd.f32 %v2287_v60, %v1094_v13  ;;  %v1968_v17 = vpop.f32.mrb[6].mxu1 }
  0xf5   : > { %v1194_v22 = vmax.f32 %v826_v18, 0.0 }
  0xf6   : > { %v2301_v23 = vpack.c.bf16 %v1196_v20, %v1195_v19  ;;  %v1263_v20 = vmax.f32 %v1103_v12, 0.0 }
  0xf7   : > { %v2303_v24 = vpack.c.bf16 %v1194_v22, %v1193_v21  ;;  %v1903_v25 = vpop.f32.mrb[8].mxu0  ;;  %v1106_v21 = vadd.f32 %v1968_v17, %v2287_v60  ;;  %v1097_v22 = vpop.f32.mrb[7].mxu1 }
  0xf8   : > { %v847_v26 = vadd.f32 %v1903_v25, %v2287_v60  ;;  %v838_v27 = vpop.f32.mrb[9].mxu0 }
  0xf9   : > { %v839_v28 = vadd.f32 %v2287_v60, %v838_v27  ;;  %v1904_v29 = vpop.f32.mrb[10].mxu0  ;;  %v1261_v27 = vmax.f32 %v1095_v16, 0.0 }
  0xfa   : > { %v850_v30 = vadd.f32 %v1904_v29, %v2287_v60  ;;  %v841_v31 = vpop.f32.mrb[11].mxu0  ;;  %v1199_v33 = vmax.f32 %v847_v26, 0.0  ;;  %v1971_v41 = vpop.f32.mrb[8].mxu1 }
  0xfb   : > { %v842_v32 = vadd.f32 %v2287_v60, %v841_v31  ;;  %v1197_v35 = vmax.f32 %v839_v28, 0.0  ;;  %v1098_v28 = vadd.f32 %v2287_v60, %v1097_v22  ;;  %v1110_v45 = vpop.f32.mrb[9].mxu1 }
  0xfc   : > { %v1200_v34 = vmax.f32 %v850_v30, 0.0  ;;  %v1264_v30 = vmax.f32 %v1106_v21, 0.0  ;;  %v1972_v49 = vpop.f32.mrb[10].mxu1 }
  0xfd   : > { %v1198_v36 = vmax.f32 %v842_v32, 0.0  ;;  %v1113_v55 = vpop.f32.mrb[11].mxu1 }
  0xfe   : > { %v2309_v37 = vpack.c.bf16 %v1200_v34, %v1199_v33  ;;  %v1262_v33 = vmax.f32 %v1098_v28, 0.0 }
  0xff   : > { %v2311_v39 = vpack.c.bf16 %v1198_v36, %v1197_v35  ;;  %v1907_v40 = vpop.f32.mrb[12].mxu0  ;;  %v2337_v36 = vpack.c.bf16 %v1264_v30, %v1263_v20 }
 0x100   : > { %v863_v43 = vadd.f32 %v1907_v40, %v2287_v60  ;;  %v854_v44 = vpop.f32.mrb[13].mxu0  ;;  %v2339_v40 = vpack.c.bf16 %v1262_v33, %v1261_v27 }
 0x101   : > { %v855_v47 = vadd.f32 %v2287_v60, %v854_v44  ;;  %v1908_v48 = vpop.f32.mrb[14].mxu0  ;;  %v1119_v44 = vadd.f32 %v1971_v41, %v2287_v60 }
 0x102   : > { %v866_v52 = vadd.f32 %v1908_v48, %v2287_v60  ;;  %v857_v53 = vpop.f32.mrb[15].mxu0  ;;  %v1203_v63 = vmax.f32 %v863_v43, 0.0  ;;  %v1111_v48 = vadd.f32 %v2287_v60, %v1110_v45 }
 0x103   : > { %v858_v61 = vadd.f32 %v2287_v60, %v857_v53  ;;  %v1201_v2 = vmax.f32 %v855_v47, 0.0  ;;  %v1122_v53 = vadd.f32 %v1972_v49, %v2287_v60 }
 0x104   : > { %v1204_v0 = vmax.f32 %v866_v52, 0.0  ;;  %v1267_v52 = vmax.f32 %v1119_v44, 0.0  ;;  %v1265_v62 = vmax.f32 %v1111_v48, 0.0 }
 0x105   : > { %v1202_v3 = vmax.f32 %v858_v61, 0.0  ;;  %v1268_v1 = vmax.f32 %v1122_v53, 0.0 }
 0x106   : > { %v2323_v5 = vpack.c.bf16 %v1204_v0, %v1203_v63  ;;  %v1114_v63 = vadd.f32 %v2287_v60, %v1113_v55 }
 0x107   : > { %v2327_v8 = vpack.c.bf16 %v1202_v3, %v1201_v2  ;;  %v1911_v11 = vpop.f32.mrb[16].mxu0  ;;  %v2350_v13 = vpack.c.bf16 %v1268_v1, %v1267_v52 }
 0x108   : > { %v879_v14 = vadd.f32 %v1911_v11, %v2287_v60  ;;  %v870_v15 = vpop.f32.mrb[17].mxu0  ;;  %v1266_v7 = vmax.f32 %v1114_v63, 0.0 }
 0x109   : > { %v871_v18 = vadd.f32 %v2287_v60, %v870_v15  ;;  %v1912_v19 = vpop.f32.mrb[18].mxu0 }
 0x10a   : > { %v882_v25 = vadd.f32 %v1912_v19, %v2287_v60  ;;  %v873_v26 = vpop.f32.mrb[19].mxu0  ;;  %v1207_v31 = vmax.f32 %v879_v14, 0.0  ;;  %v2353_v15 = vpack.c.bf16 %v1266_v7, %v1265_v62 }
 0x10b   : > { %v874_v29 = vadd.f32 %v2287_v60, %v873_v26  ;;  %v1205_v34 = vmax.f32 %v871_v18, 0.0 }
 0x10c   : > { %v1208_v32 = vmax.f32 %v882_v25, 0.0 }
 0x10d   : > { %v1206_v35 = vmax.f32 %v874_v29, 0.0 }
 0x10e   : > { %v1336_v38 = vpack.c.bf16 %v1208_v32, %v1207_v31 }
 0x10f   : > { %v1335_v42 = vpack.c.bf16 %v1206_v35, %v1205_v34  ;;  %v1915_v43 = vpop.f32.mrb[20].mxu0 }
 0x110   : > { %v895_v46 = vadd.f32 %v1915_v43, %v2287_v60  ;;  %v886_v47 = vpop.f32.mrb[21].mxu0 }
 0x111   : > { %v887_v50 = vadd.f32 %v2287_v60, %v886_v47  ;;  %v1916_v51 = vpop.f32.mrb[22].mxu0  ;;  %1818 = vmatprep.subr.bf16.mxu1 %v1335_v42 }
 0x112   : > { %v898_v56 = vadd.f32 %v1916_v51, %v2287_v60  ;;  %v889_v61 = vpop.f32.mrb[23].mxu0  ;;  %1819 = vmatpush3.bf16.msra.mxu1 %v2295_v10  ;;  %v1211_v2 = vmax.f32 %v895_v46, 0.0  ;;  %v1975_v10 = vpop.f32.mrb[12].mxu1 }
 0x113   : > { %v890_v0 = vadd.f32 %v2287_v60, %v889_v61  ;;  %1820 = vmatprep.subr.bf16.mxu1 %v1336_v38  ;;  %v1209_v11 = vmax.f32 %v887_v50, 0.0  ;;  %v1135_v18 = vadd.f32 %v1975_v10, %v2287_v60  ;;  %v1126_v19 = vpop.f32.mrb[13].mxu1 }
 0x114   : > { %v1212_v3 = vmax.f32 %v898_v56, 0.0  ;;  %v1127_v22 = vadd.f32 %v2287_v60, %v1126_v19  ;;  %v1976_v25 = vpop.f32.mrb[14].mxu1 }
 0x115   : > { %v1210_v12 = vmax.f32 %v890_v0, 0.0  ;;  %v1271_v28 = vmax.f32 %v1135_v18, 0.0  ;;  %v1129_v29 = vpop.f32.mrb[15].mxu1 }
 0x116   : > { %v1338_v14 = vpack.c.bf16 %v1212_v3, %v1211_v2  ;;  %1821 = vmatpush3.bf16.msra.mxu1 %v2293_v9  ;;  %v1138_v9 = vadd.f32 %v1976_v25, %v2287_v60  ;;  %v1269_v32 = vmax.f32 %v1127_v22, 0.0  ;;  %v1130_v33 = vadd.f32 %v2287_v60, %v1129_v29 }
 0x117   : > { %v1337_v16 = vpack.c.bf16 %v1210_v12, %v1209_v11  ;;  %v1919_v17 = vpop.f32.mrb[24].mxu0 }
 0x118   : > { %v911_v20 = vadd.f32 %v1919_v17, %v2287_v60  ;;  %v902_v21 = vpop.f32.mrb[25].mxu0  ;;  %v1272_v35 = vmax.f32 %v1138_v9, 0.0  ;;  %v1270_v42 = vmax.f32 %v1130_v33, 0.0  ;;  %v1291_v17 = vadd.s32 384, %v2274_v54 }
 0x119   : > { %v903_v26 = vadd.f32 %v2287_v60, %v902_v21  ;;  %v1920_v27 = vpop.f32.mrb[26].mxu0  ;;  %1822 = vmatprep.subr.bf16.mxu1 %v1337_v16 }
 0x11a   : > { %v914_v30 = vadd.f32 %v1920_v27, %v2287_v60  ;;  %v905_v31 = vpop.f32.mrb[27].mxu0  ;;  %1823 = vmatpush3.bf16.msra.mxu1 %v2303_v24  ;;  %v1215_v38 = vmax.f32 %v911_v20, 0.0  ;;  %v2364_v45 = vpack.c.bf16 %v1272_v35, %v1271_v28  ;;  %v2367_v47 = vpack.c.bf16 %v1270_v42, %v1269_v32  ;;  %v1979_v24 = vpop.f32.mrb[16].mxu1 }
 0x11b   : > { %v906_v34 = vadd.f32 %v2287_v60, %v905_v31  ;;  %1824 = vmatprep.subr.bf16.mxu1 %v1338_v14  ;;  %v1213_v43 = vmax.f32 %v903_v26, 0.0  ;;  %v1151_v50 = vadd.f32 %v1979_v24, %v2287_v60  ;;  %v1142_v51 = vpop.f32.mrb[17].mxu1  ;;  %vm1298_vm8 = vcmp.ge.s32.totalorder %v1291_v17, %v2277_v57 }
 0x11c   : > { %v1216_v41 = vmax.f32 %v914_v30, 0.0  ;;  %v1143_v55 = vadd.f32 %v2287_v60, %v1142_v51  ;;  %v1980_v56 = vpop.f32.mrb[18].mxu1  ;;  %vm1306_vm9 = vcmp.lt.s32.totalorder %v1291_v17, %v2279_v58 }
 0x11d   : > { %v1214_v44 = vmax.f32 %v906_v34, 0.0  ;;  %v1275_v63 = vmax.f32 %v1151_v50, 0.0  ;;  %v1145_v0 = vpop.f32.mrb[19].mxu1  ;;  %vm2413_vm11 = vmand %vm1298_vm8, %vm1306_vm9 }
 0x11e   : > { %v1340_v46 = vpack.c.bf16 %v1216_v41, %v1215_v38  ;;  %1825 = vmatpush3.bf16.msra.mxu1 %v2301_v23  ;;  %v1154_v23 = vadd.f32 %v1980_v56, %v2287_v60  ;;  %v1273_v3 = vmax.f32 %v1143_v55, 0.0  ;;  %v1146_v7 = vadd.f32 %v2287_v60, %v1145_v0  ;;  %v1983_v22 = vpop.f32.mrb[20].mxu1  ;;  %vm1753_vm13 = vmpackc.low %vm2413_vm11, %vm2413_vm11 }
 0x11f   : > { %v1339_v48 = vpack.c.bf16 %v1214_v44, %v1213_v43  ;;  %v1923_v49 = vpop.f32.mrb[28].mxu0  ;;  %v1167_v27 = vadd.f32 %v1983_v22, %v2287_v60  ;;  %v1158_v28 = vpop.f32.mrb[21].mxu1  ;;  %vm1519_vm11 = vcmask 261120  }
 0x120   : > { %v927_v52 = vadd.f32 %v1923_v49, %v2287_v60  ;;  %v918_v53 = vpop.f32.mrb[29].mxu0  ;;  %v1276_v12 = vmax.f32 %v1154_v23, 0.0  ;;  %v1274_v16 = vmax.f32 %v1146_v7, 0.0  ;;  %v1984_v30 = vpop.f32.mrb[22].mxu1 }
 0x121   : > { %v919_v61 = vadd.f32 %v2287_v60, %v918_v53  ;;  %v1924_v62 = vpop.f32.mrb[30].mxu0  ;;  %1826 = vmatprep.subr.bf16.mxu1 %v1339_v48  ;;  %v1279_v33 = vmax.f32 %v1167_v27, 0.0  ;;  %v1170_v34 = vadd.f32 %v1984_v30, %v2287_v60  ;;  %v1161_v35 = vpop.f32.mrb[23].mxu1 }
 0x122   : > { %v930_v1 = vadd.f32 %v1924_v62, %v2287_v60  ;;  %v921_v2 = vpop.f32.mrb[31].mxu0  ;;  %1827 = vmatpush3.bf16.msra.mxu1 %v2311_v39  ;;  %v1219_v14 = vmax.f32 %v927_v52, 0.0  ;;  %v2379_v20 = vpack.c.bf16 %v1276_v12, %v1275_v63  ;;  %v2382_v39 = vpack.c.bf16 %v1274_v16, %v1273_v3 }
 0x123   : > { %v922_v11 = vadd.f32 %v2287_v60, %v921_v2  ;;  %1828 = vmatprep.subr.bf16.mxu1 %v1340_v46  ;;  %v1217_v18 = vmax.f32 %v919_v61, 0.0  ;;  %v1162_v43 = vadd.f32 %v2287_v60, %v1161_v35  ;;  %v1280_v24 = vmax.f32 %v1170_v34, 0.0  ;;  %v1987_v61 = vpop.f32.mrb[24].mxu1 }
 0x124   : > { %v1220_v10 = vmax.f32 %v930_v1, 0.0  ;;  %v1183_v23 = vadd.f32 %v1987_v61, %v2287_v60  ;;  %v1174_v0 = vpop.f32.mrb[25].mxu1 }
 0x125   : > { %v1218_v19 = vmax.f32 %v922_v11, 0.0  ;;  %v1278_v50 = vmax.f32 %v1162_v43, 0.0  ;;  %v2417_v53 = vpack.c.bf16 %v1280_v24, %v1279_v33  ;;  %v1175_v2 = vadd.f32 %v2287_v60, %v1174_v0  ;;  %v1988_v3 = vpop.f32.mrb[26].mxu1 }
 0x126   : > { %v1342_v21 = vpack.c.bf16 %v1220_v10, %v1219_v14  ;;  %1829 = vmatpush3.bf16.msra.mxu1 %v2309_v37  ;;  %v1159_v37 = vadd.f32 %v2287_v60, %v1158_v28  ;;  %v1283_v12 = vmax.f32 %v1183_v23, 0.0  ;;  %v1186_v14 = vadd.f32 %v1988_v3, %v2287_v60  ;;  %v1177_v10 = vpop.f32.mrb[27].mxu1 }
 0x127   : > { %v1341_v25 = vpack.c.bf16 %v1218_v19, %v1217_v18  ;;  %v1927_v26 = vpop.f32.mrb[32].mxu0  ;;  %v1281_v18 = vmax.f32 %v1175_v2, 0.0  ;;  %v1178_v19 = vadd.f32 %v2287_v60, %v1177_v10 }
 0x128   : > { %v943_v9 = vadd.f32 %v1927_v26, %v2287_v60  ;;  %v934_v29 = vpop.f32.mrb[33].mxu0  ;;  %v1277_v42 = vmax.f32 %v1159_v37, 0.0  ;;  %v1284_v22 = vmax.f32 %v1186_v14, 0.0 }
 0x129   : > { %v935_v31 = vadd.f32 %v2287_v60, %v934_v29  ;;  %v1928_v32 = vpop.f32.mrb[34].mxu0  ;;  %1830 = vmatprep.subr.bf16.mxu1 %v1341_v25  ;;  %v1282_v27 = vmax.f32 %v1178_v19, 0.0 }
 0x12a   : > { %v946_v38 = vadd.f32 %v1928_v32, %v2287_v60  ;;  %v937_v41 = vpop.f32.mrb[35].mxu0  ;;  %1831 = vmatpush3.bf16.msra.mxu1 %v2327_v8  ;;  %v1223_v48 = vmax.f32 %v943_v9, 0.0  ;;  %v2425_v56 = vpack.c.bf16 %v1278_v50, %v1277_v42  ;;  %v2442_v29 = vpack.c.bf16 %v1284_v22, %v1283_v12 }
 0x12b   : > { %v938_v44 = vadd.f32 %v2287_v60, %v937_v41  ;;  %1832 = vmatprep.subr.bf16.mxu1 %v1342_v21  ;;  %v1221_v51 = vmax.f32 %v935_v31, 0.0  ;;  %v2446_v30 = vpack.c.bf16 %v1282_v27, %v1281_v18 }
 0x12c   : > { %v1224_v49 = vmax.f32 %v946_v38, 0.0 }
 0x12d   : > { %v1222_v52 = vmax.f32 %v938_v44, 0.0 }
 0x12e   : > { %v2419_v55 = vpack.c.bf16 %v1224_v49, %v1223_v48  ;;  %1833 = vmatpush3.bf16.msra.mxu1 %v2323_v5 }
 0x12f   : > { %v2427_v62 = vpack.c.bf16 %v1222_v52, %v1221_v51  ;;  %v1931_v63 = vpop.f32.mrb[36].mxu0 }
 0x130   : > { %v959_v1 = vadd.f32 %v1931_v63, %v2287_v60  ;;  %v950_v5 = vpop.f32.mrb[37].mxu0 }
 0x131   : > { %v951_v7 = vadd.f32 %v2287_v60, %v950_v5  ;;  %v1932_v11 = vpop.f32.mrb[38].mxu0  ;;  %1752 = vmatmul.mubr.msk.bf16.vlgmr.msra.gmra.mrb[28].mxu1 %vm1751_vm12, %v2110_v59 }
 0x132   : > { %v962_v16 = vadd.f32 %v1932_v11, %v2287_v60  ;;  %v953_v17 = vpop.f32.mrb[39].mxu0  ;;  %1754 = vmatprep.mubr.msk.bf16.mxu1 %vm1753_vm13, %v2110_v59  ;;  %v1227_v25 = vmax.f32 %v959_v1, 0.0 }
 0x133   : > { %v954_v21 = vadd.f32 %v2287_v60, %v953_v17  ;;  %v1225_v28 = vmax.f32 %v951_v7, 0.0 }
 0x134   : > { %v1228_v26 = vmax.f32 %v962_v16, 0.0 }
 0x135   : > { %v1226_v9 = vmax.f32 %v954_v21, 0.0 }
 0x136   : > { %v2444_v37 = vpack.c.bf16 %v1228_v26, %v1227_v25 }
 0x137   : > { %v2448_v31 = vpack.c.bf16 %v1226_v9, %v1225_v28  ;;  %v1935_v32 = vpop.f32.mrb[40].mxu0 }
 0x138   : > { %v975_v33 = vadd.f32 %v1935_v32, %v2287_v60  ;;  %v966_v34 = vpop.f32.mrb[41].mxu0 }
 0x139   : > { %v967_v35 = vadd.f32 %v2287_v60, %v966_v34  ;;  %v1936_v38 = vpop.f32.mrb[42].mxu0 }
 0x13a   : > { %v978_v41 = vadd.f32 %v1936_v38, %v2287_v60  ;;  %v969_v42 = vpop.f32.mrb[43].mxu0  ;;  %v1231_v44 = vmax.f32 %v975_v33, 0.0 }
 0x13b   : > { %v970_v43 = vadd.f32 %v2287_v60, %v969_v42  ;;  %v1229_v24 = vmax.f32 %v967_v35, 0.0 }
 0x13c   : > { %v1232_v46 = vmax.f32 %v978_v41, 0.0 }
 0x13d   : > { %v1230_v48 = vmax.f32 %v970_v43, 0.0 }
 0x13e   : > { %v2454_v49 = vpack.c.bf16 %v1232_v46, %v1231_v44 }
 0x13f   : > { %v2456_v8 = vpack.c.bf16 %v1230_v48, %v1229_v24  ;;  %v1939_v50 = vpop.f32.mrb[44].mxu0 }
 0x140   : > { %v991_v51 = vadd.f32 %v1939_v50, %v2287_v60  ;;  %v982_v52 = vpop.f32.mrb[45].mxu0 }
 0x141   : > { %v983_v61 = vadd.f32 %v2287_v60, %v982_v52  ;;  %v1940_v63 = vpop.f32.mrb[46].mxu0 }
 0x142   : > { %v994_v23 = vadd.f32 %v1940_v63, %v2287_v60  ;;  %v985_v0 = vpop.f32.mrb[47].mxu0  ;;  %v1235_v5 = vmax.f32 %v991_v51, 0.0 }
 0x143   : > { %v986_v1 = vadd.f32 %v2287_v60, %v985_v0  ;;  %v1233_v3 = vmax.f32 %v983_v61, 0.0 }
 0x144   : > { %v1236_v2 = vmax.f32 %v994_v23, 0.0 }
 0x145   : > { %v1234_v7 = vmax.f32 %v986_v1, 0.0 }
 0x146   : > { %v2462_v11 = vpack.c.bf16 %v1236_v2, %v1235_v5 }
 0x147   : > { %v2464_v12 = vpack.c.bf16 %v1234_v7, %v1233_v3  ;;  %v1943_v14 = vpop.f32.mrb[48].mxu0 }
 0x148   : > { %v1007_v10 = vadd.f32 %v1943_v14, %v2287_v60  ;;  %v998_v16 = vpop.f32.mrb[49].mxu0 }
 0x149   : > { %v999_v17 = vadd.f32 %v2287_v60, %v998_v16  ;;  %v1944_v18 = vpop.f32.mrb[50].mxu0 }
 0x14a   : > { %v1010_v19 = vadd.f32 %v1944_v18, %v2287_v60  ;;  %v1001_v21 = vpop.f32.mrb[51].mxu0  ;;  %v1239_v25 = vmax.f32 %v1007_v10, 0.0 }
 0x14b   : > { %v1002_v22 = vadd.f32 %v2287_v60, %v1001_v21  ;;  %v1237_v27 = vmax.f32 %v999_v17, 0.0 }
 0x14c   : > { %v1240_v26 = vmax.f32 %v1010_v19, 0.0 }
 0x14d   : > { %v1238_v28 = vmax.f32 %v1002_v22, 0.0 }
 0x14e   : > { %v1352_v9 = vpack.c.bf16 %v1240_v26, %v1239_v25 }
 0x14f   : > { %v1351_v32 = vpack.c.bf16 %v1238_v28, %v1237_v27  ;;  %v1947_v33 = vpop.f32.mrb[52].mxu0 }
 0x150   : > { %v1023_v34 = vadd.f32 %v1947_v33, %v2287_v60  ;;  %v1014_v35 = vpop.f32.mrb[53].mxu0  ;;  %v1293_v33 = vadd.s32 640, %v2274_v54 }
 0x151   : > { %v1015_v38 = vadd.f32 %v2287_v60, %v1014_v35  ;;  %v1948_v41 = vpop.f32.mrb[54].mxu0  ;;  %1840 = vmatprep.subr.bf16.mxu1 %v1351_v32 }
 0x152   : > { %v1026_v42 = vadd.f32 %v1948_v41, %v2287_v60  ;;  %v1017_v43 = vpop.f32.mrb[55].mxu0  ;;  %1841 = vmatpush3.bf16.msra.mxu1 %v2427_v62  ;;  %v1243_v46 = vmax.f32 %v1023_v34, 0.0  ;;  %vm1300_vm0 = vcmp.ge.s32.totalorder %v1293_v33, %v2277_v57  ;;  %vm1308_vm1 = vcmp.lt.s32.totalorder %v1293_v33, %v2279_v58 }
 0x153   : > { %v1018_v44 = vadd.f32 %v2287_v60, %v1017_v43  ;;  %1842 = vmatprep.subr.bf16.mxu1 %v1352_v9  ;;  %v1241_v48 = vmax.f32 %v1015_v38, 0.0  ;;  %vm1314_vm3 = vmand %vm1300_vm0, %vm1308_vm1 }
 0x154   : > { %v1244_v24 = vmax.f32 %v1026_v42, 0.0  ;;  %vm1757_vm5 = vmpackc.low %vm1314_vm3, %vm1314_vm3 }
 0x155   : > { %v1242_v50 = vmax.f32 %v1018_v44, 0.0 }
 0x156   : > { %v1354_v51 = vpack.c.bf16 %v1244_v24, %v1243_v46  ;;  %1843 = vmatpush3.bf16.msra.mxu1 %v2419_v55 }
 0x157   : > { %v1353_v52 = vpack.c.bf16 %v1242_v50, %v1241_v48  ;;  %v1951_v61 = vpop.f32.mrb[56].mxu0 }
 0x158   : > { %v1039_v63 = vadd.f32 %v1951_v61, %v2287_v60  ;;  %v1030_v23 = vpop.f32.mrb[57].mxu0 }
 0x159   : > { %v1031_v0 = vadd.f32 %v2287_v60, %v1030_v23  ;;  %v1952_v1 = vpop.f32.mrb[58].mxu0  ;;  %1844 = vmatprep.subr.bf16.mxu1 %v1353_v52  ;;  %v1761_v23 = vld [vmem:[%s2546_s4] ss:$0 sm:$0xff] }
 0x15a   : > { %v1042_v62 = vadd.f32 %v1952_v1, %v2287_v60  ;;  %v1033_v5 = vpop.f32.mrb[59].mxu0  ;;  %1845 = vmatpush3.bf16.msra.mxu1 %v2448_v31  ;;  %v1247_v3 = vmax.f32 %v1039_v63, 0.0 }
 0x15b   : > { %v1034_v2 = vadd.f32 %v2287_v60, %v1033_v5  ;;  %1846 = vmatprep.subr.bf16.mxu1 %v1354_v51  ;;  %v1245_v55 = vmax.f32 %v1031_v0, 0.0 }
 0x15c   : > { %v1248_v7 = vmax.f32 %v1042_v62, 0.0 }
 0x15d   : > { %v1246_v14 = vmax.f32 %v1034_v2, 0.0 }
 0x15e   : > { %v1356_v10 = vpack.c.bf16 %v1248_v7, %v1247_v3  ;;  %1847 = vmatpush3.bf16.msra.mxu1 %v2444_v37  ;;  %v1290_v37 = vadd.s32 256, %v2274_v54 }
 0x15f   : > { %v1355_v16 = vpack.c.bf16 %v1246_v14, %v1245_v55  ;;  %v1955_v17 = vpop.f32.mrb[60].mxu0 }
 0x160   : > { %v1055_v18 = vadd.f32 %v1955_v17, %v2287_v60  ;;  %v1046_v19 = vpop.f32.mrb[61].mxu0  ;;  %vm1297_vm14 = vcmp.ge.s32.totalorder %v1290_v37, %v2277_v57  ;;  %vm1305_vm15 = vcmp.lt.s32.totalorder %v1290_v37, %v2279_v58 }
 0x161   : > { %v1047_v21 = vadd.f32 %v2287_v60, %v1046_v19  ;;  %v1956_v22 = vpop.f32.mrb[62].mxu0  ;;  %1848 = vmatprep.subr.bf16.mxu1 %v1355_v16  ;;  %vm1311_vm2 = vmand %vm1297_vm14, %vm1305_vm15 }
 0x162   : > { %v1058_v31 = vadd.f32 %v1956_v22, %v2287_v60  ;;  %v1049_v25 = vpop.f32.mrb[63].mxu0  ;;  %1849 = vmatpush3.bf16.msra.mxu1 %v2456_v8  ;;  %v1251_v27 = vmax.f32 %v1055_v18, 0.0  ;;  %vm1755_vm4 = vmpackc.low %vm1311_vm2, %vm1311_vm2 }
 0x163   : > { %v1050_v26 = vadd.f32 %v2287_v60, %v1049_v25  ;;  %1850 = vmatprep.subr.bf16.mxu1 %v1356_v10  ;;  %v1249_v9 = vmax.f32 %v1047_v21, 0.0 }
 0x164   : > { %v1252_v28 = vmax.f32 %v1058_v31, 0.0 }
 0x165   : > { %v1250_v32 = vmax.f32 %v1050_v26, 0.0 }
 0x166   : > { %v1358_v34 = vpack.c.bf16 %v1252_v28, %v1251_v27  ;;  %1851 = vmatpush3.bf16.msra.mxu1 %v2454_v49 }
 0x167   : > { %v1357_v35 = vpack.c.bf16 %v1250_v32, %v1249_v9  ;;  %v1959_v38 = vpop.f32.mrb[64].mxu0 }
 0x168   : > { %v1071_v41 = vadd.f32 %v1959_v38, %v2287_v60  ;;  %v1062_v42 = vpop.f32.mrb[65].mxu0 }
 0x169   : > { %v1063_v8 = vadd.f32 %v2287_v60, %v1062_v42  ;;  %v1960_v43 = vpop.f32.mrb[66].mxu0  ;;  %1852 = vmatprep.subr.bf16.mxu1 %v1357_v35 }
 0x16a   : > { %v1255_v44 = vmax.f32 %v1071_v41, 0.0  ;;  %v1074_v49 = vadd.f32 %v1960_v43, %v2287_v60  ;;  %v1065_v46 = vpop.f32.mrb[67].mxu0  ;;  %1853 = vmatpush3.bf16.msra.mxu1 %v2464_v12 }
 0x16b   : > { %v1066_v24 = vadd.f32 %v2287_v60, %v1065_v46  ;;  %1854 = vmatprep.subr.bf16.mxu1 %v1358_v34  ;;  %v1253_v50 = vmax.f32 %v1063_v8, 0.0  ;;  %v1292_v60 = vadd.s32 512, %v2274_v54  ;;  %v2084_v54 = vld [vmem:[%s2545_s3] sm:$0xff]  }
 0x16c   : > { %v1256_v48 = vmax.f32 %v1074_v49, 0.0 }
 0x16d   : > { %v1254_v51 = vmax.f32 %v1066_v24, 0.0  ;;  %vm1299_vm6 = vcmp.ge.s32.totalorder %v1292_v60, %v2277_v57  ;;  %vm1307_vm7 = vcmp.lt.s32.totalorder %v1292_v60, %v2279_v58  ;;  %v2085_v57 = vld [vmem:[%s2545_s3 + $0x8] sm:$0xff]  }
 0x16e   : > { %v1360_v52 = vpack.c.bf16 %v1256_v48, %v1255_v44  ;;  %1855 = vmatpush3.bf16.msra.mxu1 %v2462_v11  ;;  %vm1313_vm8 = vmand %vm1299_vm6, %vm1307_vm7 }
 0x16f   : > { %v1359_v61 = vpack.c.bf16 %v1254_v51, %v1253_v50  ;;  %1862 = vmatprep.subr.bf16.mxu1 %v2367_v47  ;;  %vm1759_vm9 = vmpackc.low %vm1313_vm8, %vm1313_vm8 }
 0x171   : > { %1756 = vmatmul.mubr.msk.bf16.vlgmr.msra.gmra.mrb[32].mxu1 %vm1755_vm4, %v2110_v59 }
 0x172   : > { %1863 = vmatpush3.bf16.msra.mxu1 %v1359_v61  ;;  %1758 = vmatprep.mubr.msk.bf16.mxu1 %vm1757_vm5, %v2110_v59 }
 0x173   : > { %1864 = vmatprep.subr.bf16.mxu1 %v2364_v45 }
 0x176   : > { %1865 = vmatpush3.bf16.msra.mxu1 %v1360_v52 }
 0x177   : > { %1866 = vmatprep.subr.bf16.mxu1 %v2382_v39 }
 0x17a   : > { %1867 = vmatpush3.bf16.msra.mxu1 %v2325_v6 }
 0x17b   : > { %1868 = vmatprep.subr.bf16.mxu1 %v2379_v20 }
 0x17e   : > { %1869 = vmatpush3.bf16.msra.mxu1 %v2321_v4  ;;  %v2111_v4 = vmov 0.0  }
 0x17f   : > { %1870 = vmatprep.subr.bf16.mxu1 %v2425_v56 }
 0x182   : > { %1871 = vmatpush3.bf16.msra.mxu1 %v2339_v40 }
 0x183   : > { %1872 = vmatprep.subr.bf16.mxu1 %v2417_v53 }
 0x186   : > { %1873 = vmatpush3.bf16.msra.mxu1 %v2337_v36 }
 0x187   : > { %1874 = vmatprep.subr.bf16.mxu1 %v2446_v30 }
 0x18a   : > { %1875 = vmatpush3.bf16.msra.mxu1 %v2353_v15 }
 0x18b   : > { %1876 = vmatprep.subr.bf16.mxu1 %v2442_v29 }
 0x18e   : > { %1877 = vmatpush3.bf16.msra.mxu1 %v2350_v13 }
 0x18f   : > { %1989 = vmatprep.subr.bf16.mxu1 %v2111_v4 }
 0x191   : > { %1760 = vmatmul.mubr.msk.bf16.vlgmr.msra.gmra.mrb[36].mxu1 %vm1759_vm9, %v2110_v59 }
 0x192   : > { %1990 = vmatpush3.bf16.msra.mxu1 %v2084_v54  ;;  %1993 = vmatprep.mubr.msk.bf16.mxu1 %vm2112_vm10, %v2111_v4 }
 0x193   : > { %1991 = vmatprep.subr.bf16.mxu1 %v2111_v4 }
 0x196   : > { %1992 = vmatpush3.bf16.msra.mxu1 %v2085_v57 }
 0x204   : > { %v1834_v58 = vpop.f32.mrb[28].mxu1 }
 0x205   : > { %v1835_v6 = vpop.f32.mrb[29].mxu1 }
 0x206   : > { %v1836_v36 = vadd.f32 %v1835_v6, %v1834_v58  ;;  %v1837_v40 = vpop.f32.mrb[30].mxu1 }
 0x207   : > { %v1838_v59 = vpop.f32.mrb[31].mxu1 }
 0x244   : > { %v1856_v13 = vpop.f32.mrb[32].mxu1 }
 0x245   : > { %v1857_v15 = vpop.f32.mrb[33].mxu1 }
 0x246   : > { %v1858_v45 = vadd.f32 %v1857_v15, %v1856_v13  ;;  %v1859_v47 = vpop.f32.mrb[34].mxu1 }
 0x247   : > { %v1860_v20 = vpop.f32.mrb[35].mxu1 }
 0x248   : > { %v1450_v39 = vadd.f32 %v1858_v45, %v1836_v36 }
 0x264   : > { %v1878_v53 = vpop.f32.mrb[36].mxu1 }
 0x265   : > { %v1879_v56 = vpop.f32.mrb[37].mxu1 }
 0x266   : > { %v1880_v29 = vadd.f32 %v1879_v56, %v1878_v53  ;;  %v1881_v30 = vpop.f32.mrb[38].mxu1 }
 0x267   : > { %v1882_v11 = vpop.f32.mrb[39].mxu1 }
 0x268   : > { %v1490_v12 = vadd.f32 %v1880_v29, %v1450_v39 }
 0x26a   : > { %v1495_v63 = vpack.c.bf16 %v1490_v12, %v1490_v12 }
 0x26c   : > { %1994 = vmatmul.mubr.msk.bf16.vlgmr.msra.gmra.mrb[40].mxu1 %vm1519_vm11, %v1495_v63 }
 0x33f   : > { %v1557_v0 = vpop.f32.mrb[40].mxu1 }
 0x340   : > { %v1558_v1 = vadd.f32 %v1761_v23, %v1557_v0  ;;  %v1995_v62 = vpop.f32.mrb[41].mxu1 }
 0x341   : > { %v1560_v5 = vpop.f32.mrb[42].mxu1 }
 0x342   : > { %v1563_v2 = vmax.f32 %v1558_v1, 0.0  ;;  %v1996_v3 = vpop.f32.mrb[43].mxu1 }
 0x344   : > { %1564 = vst [vmem:[%s258_s22] sm:$0x7] %v1563_v2 }
 0x345 PF: > { %s15_s20 = sadd.s32 1, %s2108_s20   ;;  %s2552_s18 = smov %s2104_s19 }
 0x346   : > { %p12_p5 = scmp.ge.s32.totalorder %s15_s20, 4   ;;  %s2553_s19 = smov %s2555_s21 }
 0x348   :  { %14 = sbr.rel (!%p12_p5) target bundleno = 2 (0x2), region = 70 }

</bundles_post_ra>
